<compile_context>
chip_gen: v7x
topology: tpu7x:2x2x1
jax: 0.10.0
libtpu: 0.0.40
codegen_flags: <defaults>
</compile_context>

<pallas_src>
import jax
import jax.numpy as jnp
import numpy as np
from jax.experimental import pallas as pl
from jax.experimental.pallas import tpu as pltpu


def _row1_view(hbm_ref):
    """Ref-view of row index 1, matching the VMEM scratch shape."""
    if len(hbm_ref.shape) == 3:          # (B, D//128, 128) packed layout
        return hbm_ref.at[1]             # -> (D//128, 128)
    return hbm_ref.at[pl.ds(1, 1)]       # (B, D) -> (1, D)


def _vector_loss_v2_kernel(pred_hbm, tgt_hbm, dot_ref, pbuf, tbuf, sems):
    # Row-1 gather folded into the kernel's own DMA; start both copies before
    # waiting so the two tiny transfers overlap.
    cp_p = pltpu.make_async_copy(_row1_view(pred_hbm), pbuf, sems.at[0])
    cp_t = pltpu.make_async_copy(_row1_view(tgt_hbm), tbuf, sems.at[1])
    cp_p.start()
    cp_t.start()
    cp_p.wait()
    cp_t.wait()

    # v5e VPU/EUP have no bf16 path; upcast after the (narrow) DMA.
    p = pbuf[...].astype(jnp.float32)    # (D//128, 128) or (1, D)
    t = tbuf[...].astype(jnp.float32)

    # Full reductions kept as (1,1) tiles so the result is written as a whole
    # (1,1) VMEM store (no scalar VMEM stores).
    p_sq = jnp.sum(p * p, axis=(0, 1), keepdims=True)      # ||pred[1]||^2
    t_sq = jnp.sum(t * t, axis=(0, 1), keepdims=True)      # ||tgt [1]||^2
    dot_raw = jnp.sum(p * t, axis=(0, 1), keepdims=True)   # <pred[1], tgt[1]>

    # Merged torch.where(norm==0, 1, norm) guard on the reciprocal norm.
    # Valid because dot_raw == 0 whenever either norm is 0.  Exact rsqrt (EUP).
    # NOTE: p_sq * t_sq can overflow f32 for |row| ~ 1e19; not a concern here.
    prod_sq = p_sq * t_sq
    scale = jnp.where(prod_sq == 0.0, jnp.ones_like(prod_sq),
                      jax.lax.rsqrt(prod_sq))

    dot_ref[...] = jnp.clip(dot_raw * scale, -1.0, 1.0)


def vector_loss_v2(pred, tgt, mag_w=0.5, dir_w=0.5):
    # mag_w / dir_w are unused by VectorLoss_v2.forward (signature parity only).
    assert pred.shape == tgt.shape and pred.ndim == 2
    B, D = pred.shape
    assert B >= 2, "row index 1 must exist (B >= 2)"

    # Sublane-dense presentation for the kernel: (B, D) -> (B, D//128, 128) is
    # a zero-copy bitcast at the XLA level; inside the kernel the row tile's
    # last two dims map to sublanes x lanes, so the VPU sees dense vregs.
    if D % 128 == 0:
        pred_k = pred.reshape(B, D // 128, 128)
        tgt_k = tgt.reshape(B, D // 128, 128)
        row_shape = (D // 128, 128)
    else:
        pred_k, tgt_k = pred, tgt
        row_shape = (1, D)

    dot_ = pl.pallas_call(
        _vector_loss_v2_kernel,
        out_shape=jax.ShapeDtypeStruct((1, 1), jnp.float32),
        in_specs=[
            pl.BlockSpec(memory_space=pl.ANY),   # full arrays stay in HBM
            pl.BlockSpec(memory_space=pl.ANY),
        ],
        out_specs=pl.BlockSpec(memory_space=pltpu.MemorySpace.VMEM),
        scratch_shapes=[
            pltpu.VMEM(row_shape, pred_k.dtype),
            pltpu.VMEM(row_shape, tgt_k.dtype),
            pltpu.SemaphoreType.DMA((2,)),
        ],
    )(pred_k, tgt_k)

    # Scalar epilogue on a single element: acos + nan_to_num + sum.
    angle = jnp.arccos(dot_[0, 0])
    return jnp.sum(jnp.nan_to_num(angle, nan=0.0))


def _reference(pred, tgt):
    # Pure-JAX reference of the PyTorch forward, for a correctness check.
    def normalize(v):
        n = jnp.linalg.norm(v, axis=1, keepdims=True)
        n = jnp.where(n == 0, jnp.ones_like(n), n)
        return v / n

    pred_n = normalize(pred)
    tgt_n = normalize(tgt)
    dot_ = jnp.clip(jnp.sum(tgt_n[1] * pred_n[1]), -1.0, 1.0)
    return jnp.sum(jnp.nan_to_num(jnp.arccos(dot_), nan=0.0))


def _check(pred, tgt):
    out = jax.block_until_ready(jax.jit(vector_loss_v2)(pred, tgt))
    ref = _reference(pred, tgt)
    np.testing.assert_allclose(np.asarray(out), np.asarray(ref),
                               rtol=1e-5, atol=1e-5)


if __name__ == "__main__":
    key = jax.random.PRNGKey(0)

    # Small, tile-friendly shape (8 sublanes x 128 lanes).
    k1, k2 = jax.random.split(key)
    pred = jax.random.normal(k1, (8, 128), dtype=jnp.float32)
    tgt = jax.random.normal(k2, (8, 128), dtype=jnp.float32)
    _check(pred, tgt)

    # Larger D exercising the sublane-dense (D//128, 128) row packing.
    k3, k4 = jax.random.split(k1)
    _check(jax.random.normal(k3, (4, 1024), dtype=jnp.float32),
           jax.random.normal(k4, (4, 1024), dtype=jnp.float32))

    # D not a multiple of 128 exercises the (1, D) masked path.
    k5, k6 = jax.random.split(k2)
    _check(jax.random.normal(k5, (8, 100), dtype=jnp.float32),
           jax.random.normal(k6, (8, 100), dtype=jnp.float32))

    # Zero-norm edge case: row 1 all zeros -> dot=0 -> acos(0)=pi/2.
    _check(pred.at[1].set(0.0), tgt)

    print("KERNEL_OK")
</pallas_src>

<mosaic_0001>
module attributes {stable_mosaic.version = 11 : i64} {
  func.func @_vector_loss_v2_kernel(%arg0: memref<8x1x128xf32, #tpu.memory_space<any>>, %arg1: memref<8x1x128xf32, #tpu.memory_space<any>>, %arg2: memref<1x1xf32, #tpu.memory_space<vmem>>, %arg3: memref<1x128xf32, #tpu.memory_space<vmem>>, %arg4: memref<1x128xf32, #tpu.memory_space<vmem>>, %arg5: memref<2x!tpu.dma_semaphore, #tpu.memory_space<semaphore_mem>>) attributes {dimension_semantics = [], scalar_prefetch = 0 : i64, scratch_operands = 3 : i64, tpu.core_type = #tpu.core_type<tc>} {
    %c1_i32 = arith.constant 1 : i32
    %c0_i32 = arith.constant 0 : i32
    %c0_i32_0 = arith.constant 0 : i32
    %c0_i32_1 = arith.constant 0 : i32
    %0 = tpu.memref_slice %arg0[%c1_i32, %c0_i32_0, %c0_i32_1] : memref<8x1x128xf32, #tpu.memory_space<any>> -> memref<1x1x128xf32, #tpu.memory_space<any>>
    %1 = tpu.memref_squeeze %0 : memref<1x1x128xf32, #tpu.memory_space<any>> -> memref<1x128xf32, #tpu.memory_space<any>>
    %2 = tpu.memref_slice %arg5[%c0_i32] : memref<2x!tpu.dma_semaphore, #tpu.memory_space<semaphore_mem>> -> memref<1x!tpu.dma_semaphore, #tpu.memory_space<semaphore_mem>>
    %3 = tpu.memref_squeeze %2 : memref<1x!tpu.dma_semaphore, #tpu.memory_space<semaphore_mem>> -> memref<!tpu.dma_semaphore, #tpu.memory_space<semaphore_mem>>
    tpu.enqueue_dma source(%1 : memref<1x128xf32, #tpu.memory_space<any>>) target(%arg3 : memref<1x128xf32, #tpu.memory_space<vmem>>) target_semaphore(%3 : memref<!tpu.dma_semaphore, #tpu.memory_space<semaphore_mem>>)
    %c1_i32_2 = arith.constant 1 : i32
    %c1_i32_3 = arith.constant 1 : i32
    %c0_i32_4 = arith.constant 0 : i32
    %c0_i32_5 = arith.constant 0 : i32
    %4 = tpu.memref_slice %arg1[%c1_i32_2, %c0_i32_4, %c0_i32_5] : memref<8x1x128xf32, #tpu.memory_space<any>> -> memref<1x1x128xf32, #tpu.memory_space<any>>
    %5 = tpu.memref_squeeze %4 : memref<1x1x128xf32, #tpu.memory_space<any>> -> memref<1x128xf32, #tpu.memory_space<any>>
    %6 = tpu.memref_slice %arg5[%c1_i32_3] : memref<2x!tpu.dma_semaphore, #tpu.memory_space<semaphore_mem>> -> memref<1x!tpu.dma_semaphore, #tpu.memory_space<semaphore_mem>>
    %7 = tpu.memref_squeeze %6 : memref<1x!tpu.dma_semaphore, #tpu.memory_space<semaphore_mem>> -> memref<!tpu.dma_semaphore, #tpu.memory_space<semaphore_mem>>
    tpu.enqueue_dma source(%5 : memref<1x128xf32, #tpu.memory_space<any>>) target(%arg4 : memref<1x128xf32, #tpu.memory_space<vmem>>) target_semaphore(%7 : memref<!tpu.dma_semaphore, #tpu.memory_space<semaphore_mem>>)
    %c1_i32_6 = arith.constant 1 : i32
    %c0_i32_7 = arith.constant 0 : i32
    %c0_i32_8 = arith.constant 0 : i32
    %c0_i32_9 = arith.constant 0 : i32
    %8 = tpu.memref_slice %arg0[%c1_i32_6, %c0_i32_8, %c0_i32_9] : memref<8x1x128xf32, #tpu.memory_space<any>> -> memref<1x1x128xf32, #tpu.memory_space<any>>
    %9 = tpu.memref_squeeze %8 : memref<1x1x128xf32, #tpu.memory_space<any>> -> memref<1x128xf32, #tpu.memory_space<any>>
    %10 = tpu.memref_slice %arg5[%c0_i32_7] : memref<2x!tpu.dma_semaphore, #tpu.memory_space<semaphore_mem>> -> memref<1x!tpu.dma_semaphore, #tpu.memory_space<semaphore_mem>>
    %11 = tpu.memref_squeeze %10 : memref<1x!tpu.dma_semaphore, #tpu.memory_space<semaphore_mem>> -> memref<!tpu.dma_semaphore, #tpu.memory_space<semaphore_mem>>
    tpu.wait_dma2 semaphore(%11 : memref<!tpu.dma_semaphore, #tpu.memory_space<semaphore_mem>>) src(%9 : memref<1x128xf32, #tpu.memory_space<any>>) dst(%arg3 : memref<1x128xf32, #tpu.memory_space<vmem>>)
    %c1_i32_10 = arith.constant 1 : i32
    %c1_i32_11 = arith.constant 1 : i32
    %c0_i32_12 = arith.constant 0 : i32
    %c0_i32_13 = arith.constant 0 : i32
    %12 = tpu.memref_slice %arg1[%c1_i32_10, %c0_i32_12, %c0_i32_13] : memref<8x1x128xf32, #tpu.memory_space<any>> -> memref<1x1x128xf32, #tpu.memory_space<any>>
    %13 = tpu.memref_squeeze %12 : memref<1x1x128xf32, #tpu.memory_space<any>> -> memref<1x128xf32, #tpu.memory_space<any>>
    %14 = tpu.memref_slice %arg5[%c1_i32_11] : memref<2x!tpu.dma_semaphore, #tpu.memory_space<semaphore_mem>> -> memref<1x!tpu.dma_semaphore, #tpu.memory_space<semaphore_mem>>
    %15 = tpu.memref_squeeze %14 : memref<1x!tpu.dma_semaphore, #tpu.memory_space<semaphore_mem>> -> memref<!tpu.dma_semaphore, #tpu.memory_space<semaphore_mem>>
    tpu.wait_dma2 semaphore(%15 : memref<!tpu.dma_semaphore, #tpu.memory_space<semaphore_mem>>) src(%13 : memref<1x128xf32, #tpu.memory_space<any>>) dst(%arg4 : memref<1x128xf32, #tpu.memory_space<vmem>>)
    %c0 = arith.constant 0 : index
    %c0_14 = arith.constant 0 : index
    %16 = vector.load %arg3[%c0, %c0_14] : memref<1x128xf32, #tpu.memory_space<vmem>>, vector<1x128xf32>
    %c0_15 = arith.constant 0 : index
    %c0_16 = arith.constant 0 : index
    %17 = vector.load %arg4[%c0_15, %c0_16] : memref<1x128xf32, #tpu.memory_space<vmem>>, vector<1x128xf32>
    %18 = arith.mulf %16, %16 : vector<1x128xf32>
    %19 = vector.shape_cast %18 : vector<1x128xf32> to vector<1x1x128xf32>
    %cst = arith.constant dense<0.000000e+00> : vector<1xf32>
    %20 = vector.multi_reduction <add>, %19, %cst [1, 2] : vector<1x1x128xf32> to vector<1xf32>
    %21 = vector.shape_cast %20 : vector<1xf32> to vector<1x1x1xf32>
    %22 = vector.extract %21[0, 0, 0] : f32 from vector<1x1x1xf32>
    %23 = vector.broadcast %22 : f32 to vector<1x1xf32>
    %24 = arith.mulf %17, %17 : vector<1x128xf32>
    %25 = vector.shape_cast %24 : vector<1x128xf32> to vector<1x1x128xf32>
    %cst_17 = arith.constant dense<0.000000e+00> : vector<1xf32>
    %26 = vector.multi_reduction <add>, %25, %cst_17 [1, 2] : vector<1x1x128xf32> to vector<1xf32>
    %27 = vector.shape_cast %26 : vector<1xf32> to vector<1x1x1xf32>
    %28 = vector.extract %27[0, 0, 0] : f32 from vector<1x1x1xf32>
    %29 = vector.broadcast %28 : f32 to vector<1x1xf32>
    %30 = arith.mulf %16, %17 : vector<1x128xf32>
    %31 = vector.shape_cast %30 : vector<1x128xf32> to vector<1x1x128xf32>
    %cst_18 = arith.constant dense<0.000000e+00> : vector<1xf32>
    %32 = vector.multi_reduction <add>, %31, %cst_18 [1, 2] : vector<1x1x128xf32> to vector<1xf32>
    %33 = vector.shape_cast %32 : vector<1xf32> to vector<1x1x1xf32>
    %34 = vector.extract %33[0, 0, 0] : f32 from vector<1x1x1xf32>
    %35 = vector.broadcast %34 : f32 to vector<1x1xf32>
    %36 = arith.mulf %23, %29 : vector<1x1xf32>
    %cst_19 = arith.constant 0.000000e+00 : f32
    %37 = vector.broadcast %cst_19 : f32 to vector<1x1xf32>
    %38 = arith.cmpf oeq, %36, %37 : vector<1x1xf32>
    %cst_20 = arith.constant 1.000000e+00 : f32
    %39 = vector.broadcast %cst_20 : f32 to vector<1x1xf32>
    %40 = math.rsqrt %36 : vector<1x1xf32>
    %41 = arith.select %38, %39, %40 : vector<1x1xi1>, vector<1x1xf32>
    %42 = arith.mulf %35, %41 : vector<1x1xf32>
    %cst_21 = arith.constant -1.000000e+00 : f32
    %cst_22 = arith.constant 1.000000e+00 : f32
    %43 = vector.broadcast %cst_21 : f32 to vector<1x1xf32>
    %44 = arith.maximumf %43, %42 : vector<1x1xf32>
    %45 = vector.broadcast %cst_22 : f32 to vector<1x1xf32>
    %46 = arith.minimumf %45, %44 : vector<1x1xf32>
    %c0_23 = arith.constant 0 : index
    %c0_24 = arith.constant 0 : index
    %47 = vector.load %arg2[%c0_23, %c0_24] : memref<1x1xf32, #tpu.memory_space<vmem>>, vector<1x1xf32>
    tpu.vector_store %arg2[%c0_23, %c0_24], %46 {strides = array<i32>} : memref<1x1xf32, #tpu.memory_space<vmem>>, vector<1x1xf32>,
    return
  }
}

</mosaic_0001>

<bundles_post_ra>
// kernel: vector_loss_v2.1
= control target key start
LH: loop header
LB: loop body
LE: loop exit
PB: predicated region body
PF: predicated region fallthrough
CT: control target
= control target key end

     0   :  { %7 = vsyncpa [#allocation6], 0  ;;  %s225_s14 = smov [#allocation2]   ;;  %s269_s0 = inlined_call_operand.hbm [shape: f32[8,1,128], index: 0, kind: input, shape index: {}]   ;;  %s270_s1 = inlined_call_operand.vmem [shape: f32[8,1,128], index: 1, kind: input, shape index: {}]   ;;  %s271_s2 = inlined_call_operand.hbm [shape: f32[1,1], index: 2, kind: output, shape index: {}]  }
   0x1   :  { %s8_s11 = scalar_lea.hbm %s269_s0, 16  ;;  %v158_v0 = vld [vmem:[%s270_s1 + $0x1] sm:$0x1]  ;;  %s16_s15 = sshll.u32 %s225_s14, 4  ;;  %s17_s15 = int_to_ptr.vmem [resolvable:$true] %s16_s15 }
   0x2   :  { %40 = vst [vmem:[#allocation3] sm:$0x1] %v158_v0  ;;  %s196_s18 = scalar_lea.hbm %s269_s0, 32  ;;  %s174_s21 = scalar_lea.hbm %s269_s0, 128 }
   0x3   :  { %p173_p0 = scmp.ne.s32.totalorder %s8_s11, %s196_s18  ;;  %p175_p1 = scmp.lt.u32.totalorder %s8_s11, %s269_s0 }
   0x4   :  { %p176_p2 = scmp.lt.u32.totalorder %s174_s21, %s196_s18  ;;  %p178_p4 = scmp.lt.u32.totalorder %s196_s18, %s8_s11 }
   0x6   :  { %p177_p3 = por %p176_p2, %p175_p1 }
   0x8   :  { %p179_p5 = por %p178_p4, %p177_p3 }
   0xa   :  { %p180_p6 = pnand %p179_p5, %p173_p0 }
   0xc   :  { %183 = shalt.err (!%p180_p6)  }
   0xd   :  { %s184_s1 = scalar_lea.vmem %s17_s15, 16  ;;  %p189_p8 = scmp.lt.s32.totalorder %s17_s15, %s17_s15 }
   0xe   :  { %p185_p7 = scmp.ne.s32.totalorder %s17_s15, %s184_s1  ;;  %p190_p9 = scmp.lt.s32.totalorder %s184_s1, %s184_s1 }
  0x10   :  { %p191_p10 = por %p190_p9, %p189_p8 }
  0x12   :  { %p192_p11 = pnand %p191_p10, %p185_p7 }
  0x14   :  { %195 = shalt.err (!%p192_p11)  }
  0x15   :  { %19 = dma.hbm_to_vmem [thread:$0]  %s8_s11, 16, %s17_s15, [#allocation4] }
  0x16   :  { %65 = vsyncadd [#allocation4 + $0x1], 16 }
  0x17   :  { %219 = dma.done.wait [#allocation4], 16 }
  0x18   :  { %220 = vsyncadd [#allocation4], 4294967280 }
  0x19   :  { %221 = dma.done.wait [#allocation4 + $0x1], 16 }
  0x1a   :  { %222 = vsyncadd [#allocation4 + $0x1], 4294967280  ;;  %v71_v1 = vld [vmem:[#allocation2] sm:$0x1]  ;;  %vm74_vm0 = vcmask 1040384   ;;  %s226_s26 = smov [#allocation5]  }
  0x1b   :  { %v72_v2 = vld [vmem:[#allocation3] sm:$0x1]  ;;  %v73_v3 = vmul.f32 %v71_v1, %v71_v1  ;;  %s125_s27 = sshll.u32 %s226_s26, 4  ;;  %vm117_vm2 = vcmask 0   ;;  %s126_s27 = int_to_ptr.vmem [resolvable:$true] %s125_s27 }
  0x1c   :  { %v86_v4 = vmul.f32 %v72_v2, %v72_v2  ;;  %v98_v5 = vmul.f32 %v72_v2, %v71_v1  ;;  %s197_s28 = scalar_lea.vmem %s126_s27, 16  ;;  %s201_s29 = scalar_lea.vmem %s126_s27, 32 }
  0x1d   :  { %v75_v6 = vsel %vm74_vm0, %v73_v3, 0.0  ;;  %p198_p12 = scmp.ne.s32.totalorder %s126_s27, %s197_s28  ;;  %p202_p13 = scmp.lt.s32.totalorder %s126_s27, %s126_s27 }
  0x1e   :  { %v99_v7 = vsel %vm74_vm0, %v98_v5, 0.0  ;;  %76 = vadd.xlane.f32.xlu0 %v75_v6  ;;  %v87_v8 = vsel %vm74_vm0, %v86_v4, 0.0  ;;  %p203_p0 = scmp.lt.s32.totalorder %s201_s29, %s197_s28 }
  0x1f   :  { %100 = vadd.xlane.f32.xlu1 %v99_v7 }
  0x20   :  { %p204_p1 = por %p203_p0, %p202_p13 }
  0x22   :  { %88 = vadd.xlane.f32.xlu0 %v87_v8  ;;  %p205_p2 = pnand %p204_p1, %p198_p12 }
  0xab   :  { %v77_v9 = vpop.xlane.xlu0 %76 }
  0xac   :  { %v101_v10 = vpop.xlane.xlu1 %100  ;;  %v78_v11 = vrot.slane %v77_v9, 4 }
  0xad   :  { %v102_v12 = vrot.slane %v101_v10, 4 }
  0xae   :  { %v79_v13 = vadd.f32 %v78_v11, %v77_v9 }
  0xaf   :  { %v103_v14 = vadd.f32 %v102_v12, %v101_v10  ;;  %v89_v15 = vpop.xlane.xlu0 %88 }
  0xb0   :  { %v80_v16 = vrot.slane %v79_v13, 2  ;;  %v90_v17 = vrot.slane %v89_v15, 4 }
  0xb1   :  { %v104_v18 = vrot.slane %v103_v14, 2 }
  0xb2   :  { %v91_v19 = vadd.f32 %v90_v17, %v89_v15  ;;  %v81_v21 = vadd.f32 %v80_v16, %v79_v13 }
  0xb3   :  { %v105_v20 = vadd.f32 %v104_v18, %v103_v14 }
  0xb4   :  { %v92_v22 = vrot.slane %v91_v19, 2  ;;  %v82_v23 = vrot.slane %v81_v21, 1 }
  0xb5   :  { %v106_v24 = vrot.slane %v105_v20, 1 }
  0xb6   :  { %v93_v25 = vadd.f32 %v92_v22, %v91_v19  ;;  %v83_v26 = vadd.f32 %v82_v23, %v81_v21 }
  0xb7   :  { %v107_v28 = vadd.f32 %v106_v24, %v105_v20 }
  0xb8   :  { %162 = vpush %v83_v26  ;;  %v94_v27 = vrot.slane %v93_v25, 1 }
  0xba   :  { %v95_v29 = vadd.f32 %v94_v27, %v93_v25 }
  0xbc   :  { %164 = vpush %v95_v29 }
  0xbd   :  { %166 = vpush %v107_v28 }
  0xe9   :  { %s163_s0 = spop %162 }
  0xea   :  { %v85_v30 = vstv %s163_s0 }
  0xed   :  { %s165_s24 = spop %164 }
  0xee   :  { %v97_v31 = vstv %s165_s24  ;;  %s167_s25 = spop %166 }
  0xef   :  { %v110_v32 = vmul.f32 %v97_v31, %v85_v30  ;;  %v109_v34 = vstv %s167_s25 }
  0xf1   :  { %170 = vrsqrt.f32 %v110_v32  ;;  %vm111_vm1 = vcmp.eq.f32.partialorder %v110_v32, 0.0 }
  0xfb   :  { %v171_v33 = vpop.eup %170 }
  0xfc   :  { %v113_v35 = vsel %vm111_vm1, 1.0, %v171_v33 }
  0xfd   :  { %v114_v36 = vmul.f32 %v113_v35, %v109_v34 }
  0xff   :  { %v159_v37 = vclamps-f32 %v114_v36, 1.0 }
 0x101   :  { %118 = vst.msk [vmem:[#allocation5] sm:$0x1] %vm117_vm2, %v159_v37 }
 0x102   :  { %208 = shalt.err (!%p205_p2)
}
 0x103   :  { %s209_s4 = scalar_lea.hbm %s271_s2, 16 }
 0x104   :  { %p210_p3 = scmp.ne.s32.totalorder %s271_s2, %s209_s4  ;;  %p213_p4 = scmp.lt.u32.totalorder %s209_s4, %s271_s2 }
 0x106   :  { %p215_p5 = pnand %p213_p4, %p210_p3 }
 0x108   :  { %218 = shalt.err (!%p215_p5)
}
 0x109   :  { %128 = dma.vmem_to_hbm [thread:$0]  %s126_s27, 16, %s271_s2, [#allocation6]  }
 0x10a   :  { %223 = dma.done.wait [#allocation6], 16  }
 0x10b   :  { %224 = vsyncadd [#allocation6], 4294967280 }
 0x10c   :  { %132 = vsyncpa [#allocation6], 1 }
 0x10d   :  { %133 = vsyncmov [#allocation4] }
 0x110   :  { %s134_s11 = vpop.sfrf %133 }
 0x111   :  { %p160_p6 = scmp.ne.s32.totalorder %s134_s11, 0 }
 0x113   :  { %138 = shalt.err (%p160_p6)  }
 0x114   :  { %140 = vsyncmov [#allocation4 + $0x1] }
 0x117   :  { %s141_s12 = vpop.sfrf %140 }
 0x118   :  { %p161_p7 = scmp.ne.s32.totalorder %s141_s12, 0 }
 0x11a   :  { %145 = shalt.err (%p161_p7)  }

</bundles_post_ra>
